<compile_context>
chip_gen: v6e
topology: v6e:2x2x1
jax: 0.10.0
libtpu: 0.0.40
codegen_flags: <defaults>
</compile_context>

<pallas_src>
import jax
import jax.numpy as jnp
from jax import lax
from jax.experimental import pallas as pl
from jax.experimental.pallas import tpu as pltpu

# ----------------------------- problem sizes -------------------------------
B = 2                      # batch
N_ENT, D_ENT = 8, 32       # entities_feat  (B, N_ENT, D_ENT)
N_HAND, D_HAND = 11, 32    # hand_card_feat (B, 11, D_HAND)
N_MIN, D_MIN = 14, 32      # minions_feat   (B, 14, D_MIN)
N_HERO, D_HERO = 2, 16     # heros_feat     (B, 2, D_HERO) -> flattened (B, 32)
HID = 32                   # hidden width of every head
N_AT = 21                  # action_type logits
N_TE = 17                  # target_entity logits
N_TC = 3                   # target_card logits
N_TP = 7                   # target_position logits
N_AT_PAD = 24              # one-hot / embedding rows padded to multiple of 8
NEG = -1e9

# bf16 params/data halve the HBM bytes on every generation (f32 accumulation
# kept).  Set both to jnp.float32 to match the PyTorch reference numerics
# exactly (argmax ties).
PARAM_DTYPE = jnp.bfloat16
DATA_DTYPE = PARAM_DTYPE

# --------------------- packed DATA slab lane layout (B, 256) -----------------
L_ENTM = 0                         # 0:32    mean over entities
L_HERO = 32                        # 32:64   hero flat
L_HANDM = 64                       # 64:96   mean over hand cards
L_MINM = 96                        # 96:128  mean over minions
L_MAT = 128                        # 128:149 action_type mask
L_MTE = L_MAT + N_AT               # 149:166 target_entity mask
L_MTC = L_MTE + N_TE               # 166:169 target_card mask
L_MTP = L_MTC + N_TC               # 169:176 target_position mask
DATA_USED = L_MTP + N_TP           # 176
DATA_LANES = 256                   # 2 lane tiles

# --------------------- packed PARAM slab (168, 128), lane co-packed ----------
# row group 1 (64 rows): [W_AT1 | W_TE1(emb;hand stacked) | W_CP1F(blockdiag)]
# row group 2 (32 rows): [W_CP1E | W_AT2 | pad | W_TE2]
# row group 3 (64 rows): [AEMB (24 rows) | W_CP2(blockdiag, 10 lanes)]
# row group 4 ( 8 rows): biases
PR_G1 = 0
PR_G2 = 64
PR_G3 = 96
PR_BIAS = 160
P_ROWS = 168

# --------------------------- output slab layout ------------------------------
OUT_AT = 0
OUT_TE = OUT_AT + N_AT             # 21
OUT_TC = OUT_TE + N_TE             # 38
OUT_TP = OUT_TC + N_TC             # 41
OUT_ACT = OUT_TP + N_TP            # 48 .. 52 (actions as f32)
OUT_LANES = 128


# ------------------------------- kernel --------------------------------------
def _masked_argmax(logits, mask):
    """Mask logits (mask==0 -> -1e9) and take first-occurrence argmax."""
    masked = jnp.where(mask > 0.0, logits, NEG)
    b, n = masked.shape
    col = lax.broadcasted_iota(jnp.int32, (b, n), 1)
    mx = jnp.max(masked, axis=1, keepdims=True)
    cand = jnp.where(masked >= mx, col, n)
    act = jnp.min(cand, axis=1, keepdims=True)          # (B, 1) int32
    return masked, act


def _policy_kernel(data_ref, p_ref, out_ref):
    f32 = jnp.float32
    b = out_ref.shape[0]

    # deterministic padding lanes; written first so it is off the tail path
    out_ref[...] = jnp.zeros_like(out_ref)

    def mm(x, w):
        return jnp.dot(x.astype(w.dtype), w, preferred_element_type=f32)

    # ---- load the co-packed weight slab as three row groups -----------------
    g1 = p_ref[PR_G1:PR_G1 + 64, :]                    # (64, 128)
    g2 = p_ref[PR_G2:PR_G2 + 32, :]                    # (32, 128)
    g3 = p_ref[PR_G3:PR_G3 + 64, :]                    # (64, 128)
    bias = p_ref[PR_BIAS:PR_BIAS + 8, :].astype(f32)   # (8, 128)

    w_at1 = g1[:, 0:HID]                               # (64, 32)
    w_te1e = g1[0:HID, HID:2 * HID]                    # (32, 32) emb part
    w_te1h = g1[HID:2 * HID, HID:2 * HID]              # (32, 32) hand part
    w_cp1f = g1[:, 2 * HID:4 * HID]                    # (64, 64) blockdiag
    w_cp1e = g2[:, 0:2 * HID]                          # (32, 64)
    w_at2 = g2[:, 2 * HID:2 * HID + N_AT]              # (32, 21)
    w_te2 = g2[:, 3 * HID:3 * HID + N_TE]              # (32, 17)
    aemb = g3[0:N_AT_PAD, 0:HID]                       # (24, 32)
    w_cp2 = g3[:, HID:HID + N_TC + N_TP]               # (64, 10) blockdiag

    b_at1 = bias[0:1, 0:HID]
    b_at2 = bias[1:2, 0:N_AT]
    b_te1 = bias[2:3, 0:HID]
    b_te2 = bias[3:4, 0:N_TE]
    b_cp1 = bias[4:5, 0:2 * HID]
    b_cp2 = bias[5:6, 0:N_TC + N_TP]

    # ------------------------- ActionTypeHead --------------------------------
    x_at = data_ref[:, L_ENTM:L_ENTM + 2 * HID]        # (B, 64) [ent_mean|hero]
    h_at = jnp.maximum(mm(x_at, w_at1) + b_at1, 0.0)   # (B, 32)
    logit_at = mm(h_at, w_at2) + b_at2                  # (B, 21)
    m_at = data_ref[:, L_MAT:L_MAT + N_AT]
    masked_at, act_at = _masked_argmax(logit_at, m_at)
    out_ref[:, OUT_AT:OUT_AT + N_AT] = jnp.tanh(masked_at)
    out_ref[:, OUT_ACT + 0:OUT_ACT + 1] = act_at.astype(f32)

    # auto-regressive embedding = hidden + embed[selected_action] (one-hot mm)
    onehot = (lax.broadcasted_iota(jnp.int32, (b, N_AT_PAD), 1)
              == act_at).astype(f32)                    # (B, 24)
    emb = h_at + mm(onehot, aemb)                       # (B, 32)

    # ------------------------ TargetEntityHead -------------------------------
    hand_m = data_ref[:, L_HANDM:L_HANDM + HID]         # (B, 32)
    h_te = jnp.maximum(mm(emb, w_te1e) + mm(hand_m, w_te1h) + b_te1, 0.0)
    logit_te = mm(h_te, w_te2) + b_te2                  # (B, 17)
    m_te = data_ref[:, L_MTE:L_MTE + N_TE]
    masked_te, act_te = _masked_argmax(logit_te, m_te)
    out_ref[:, OUT_TE:OUT_TE + N_TE] = jnp.tanh(masked_te)
    out_ref[:, OUT_ACT + 1:OUT_ACT + 2] = act_te.astype(f32)
    emb2 = h_te   # passed on to the next two heads (synthesized chain)

    # -------------- fused TargetCardHead + TargetPositionHead ----------------
    x_hm = data_ref[:, L_HANDM:L_HANDM + 2 * HID]       # (B, 64) [hand_m|min_m]
    h_cp = jnp.maximum(mm(emb2, w_cp1e) + mm(x_hm, w_cp1f) + b_cp1, 0.0)  # (B,64)
    logit_cp = mm(h_cp, w_cp2) + b_cp2                  # (B, 10)
    m_tc = data_ref[:, L_MTC:L_MTC + N_TC]
    m_tp = data_ref[:, L_MTP:L_MTP + N_TP]
    masked_tc, act_tc = _masked_argmax(logit_cp[:, 0:N_TC], m_tc)
    masked_tp, act_tp = _masked_argmax(logit_cp[:, N_TC:N_TC + N_TP], m_tp)
    out_ref[:, OUT_TC:OUT_TC + N_TC] = jnp.tanh(masked_tc)
    out_ref[:, OUT_TP:OUT_TP + N_TP] = jnp.tanh(masked_tp)
    out_ref[:, OUT_ACT + 2:OUT_ACT + 3] = act_tc.astype(f32)
    out_ref[:, OUT_ACT + 3:OUT_ACT + 4] = act_tp.astype(f32)


# ------------------------------ parameters -----------------------------------
def init_params(key):
    ks = jax.random.split(key, 17)
    s = 0.1

    def w(k, shape):
        return jax.random.normal(k, shape, jnp.float32) * s

    return {
        # ActionTypeHead (acts on [ent_mean(32), hero(32)])
        "wa1": w(ks[0], (D_ENT + N_HERO * D_HERO, HID)),
        "ba1": w(ks[1], (1, HID)),
        "wa2": w(ks[2], (HID, N_AT)),
        "ba2": w(ks[3], (1, N_AT)),
        "aemb": w(ks[4], (N_AT, HID)),
        # TargetEntityHead (acts on [emb(32), hand_mean(32)])
        "we1": w(ks[5], (HID + D_HAND, HID)),
        "be1": w(ks[6], (1, HID)),
        "we2": w(ks[7], (HID, N_TE)),
        "be2": w(ks[8], (1, N_TE)),
        # TargetCardHead (acts on [emb2(32), hand_mean(32)])
        "wc1": w(ks[9], (HID + D_HAND, HID)),
        "bc1": w(ks[10], (1, HID)),
        "wc2": w(ks[11], (HID, N_TC)),
        "bc2": w(ks[12], (1, N_TC)),
        # TargetPositionHead (acts on [emb2(32), min_mean(32)])
        "wp1": w(ks[13], (HID + D_MIN, HID)),
        "bp1": w(ks[14], (1, HID)),
        "wp2": w(ks[15], (HID, N_TP)),
        "bp2": w(ks[16], (1, N_TP)),
    }


def pack_params(p, dtype=PARAM_DTYPE):
    """Build the (168, 128) lane co-packed parameter slab (once on the host)."""
    slab = jnp.zeros((P_ROWS, 128), jnp.float32)

    def put(s, r, c, arr):
        return s.at[r:r + arr.shape[0], c:c + arr.shape[1]].set(arr)

    # row group 1 (64 rows)
    slab = put(slab, PR_G1, 0, p["wa1"])                    # [ent_mean|hero] -> hid
    slab = put(slab, PR_G1, HID, p["we1"][:HID])            # TE emb part
    slab = put(slab, PR_G1 + HID, HID, p["we1"][HID:])      # TE hand part
    slab = put(slab, PR_G1, 2 * HID, p["wc1"][HID:])        # TC hand part (blockdiag)
    slab = put(slab, PR_G1 + HID, 3 * HID, p["wp1"][HID:])  # TP min part  (blockdiag)
    # row group 2 (32 rows)
    slab = put(slab, PR_G2, 0, p["wc1"][:HID])              # TC emb part
    slab = put(slab, PR_G2, HID, p["wp1"][:HID])            # TP emb part
    slab = put(slab, PR_G2, 2 * HID, p["wa2"])
    slab = put(slab, PR_G2, 3 * HID, p["we2"])
    # row group 3 (64 rows)
    slab = put(slab, PR_G3, 0, p["aemb"])                   # rows 0:21 (pad to 24)
    slab = put(slab, PR_G3, HID, p["wc2"])                  # blockdiag cols 0:3
    slab = put(slab, PR_G3 + HID, HID + N_TC, p["wp2"])     # blockdiag cols 3:10
    # bias block (8 rows)
    slab = put(slab, PR_BIAS + 0, 0, p["ba1"])
    slab = put(slab, PR_BIAS + 1, 0, p["ba2"])
    slab = put(slab, PR_BIAS + 2, 0, p["be1"])
    slab = put(slab, PR_BIAS + 3, 0, p["be2"])
    slab = put(slab, PR_BIAS + 4, 0, p["bc1"])
    slab = put(slab, PR_BIAS + 4, HID, p["bp1"])
    slab = put(slab, PR_BIAS + 5, 0, p["bc2"])
    slab = put(slab, PR_BIAS + 5, N_TC, p["bp2"])
    return slab.astype(dtype)


# -------------------------------- wrapper ------------------------------------
def _pack_data(entities_feat, hand_card_feat, minions_feat, heros_feat, mask):
    """Compute the per-group means in XLA and pack one (B, 256) lane-dense slab."""
    b = entities_feat.shape[0]
    dt = DATA_DTYPE
    return jnp.concatenate([
        entities_feat.astype(jnp.float32).mean(axis=1).astype(dt),   # 0:32
        heros_feat.reshape(b, -1).astype(dt),                        # 32:64
        hand_card_feat.astype(jnp.float32).mean(axis=1).astype(dt),  # 64:96
        minions_feat.astype(jnp.float32).mean(axis=1).astype(dt),    # 96:128
        mask["action_type"].astype(dt),                              # 128:149
        mask["target_entity"].astype(dt),                            # 149:166
        mask["target_card"].astype(dt),                              # 166:169
        mask["target_position"].astype(dt),                          # 169:176
        jnp.zeros((b, DATA_LANES - DATA_USED), dt),                  # 176:256
    ], axis=-1)


@jax.jit
def policy_forward(entities_feat, hand_card_feat, minions_feat, heros_feat,
                   secret_value, mask, param_slab):
    del secret_value  # unused in Policy.forward (matches the reference)
    b = entities_feat.shape[0]

    data = _pack_data(entities_feat, hand_card_feat, minions_feat, heros_feat,
                      mask)

    flops = 2 * b * (2 * HID * HID        # w_at1
                     + HID * N_AT         # w_at2
                     + N_AT_PAD * HID     # aemb one-hot
                     + 2 * HID * HID      # w_te1e + w_te1h
                     + HID * N_TE         # w_te2
                     + HID * 2 * HID      # w_cp1e
                     + 2 * HID * 2 * HID  # w_cp1f
                     + 2 * HID * (N_TC + N_TP))
    cost = pl.CostEstimate(
        flops=flops,
        transcendentals=b * (N_AT + N_TE + N_TC + N_TP),
        bytes_accessed=(param_slab.size * param_slab.dtype.itemsize
                        + data.size * data.dtype.itemsize
                        + 4 * b * OUT_LANES))

    # TODO(synk): the ~43 KiB param slab is constant across calls; if this is
    # called in a tight loop, cache it in a persistent VMEM ref (pl.get_global
    # + one-time DMA) or batch several env states per call (add a batch grid
    # axis marked "parallel" so both v7x TensorCores are used).
    vmem = pl.BlockSpec(memory_space=pltpu.MemorySpace.VMEM)
    out = pl.pallas_call(
        _policy_kernel,
        out_shape=jax.ShapeDtypeStruct((b, OUT_LANES), jnp.float32),
        in_specs=[vmem, vmem],
        out_specs=vmem,
        cost_estimate=cost,
    )(data, param_slab)

    logit = {
        "action_type": out[:, OUT_AT:OUT_AT + N_AT],
        "target_entity": out[:, OUT_TE:OUT_TE + N_TE],
        "target_card": out[:, OUT_TC:OUT_TC + N_TC],
        "target_position": out[:, OUT_TP:OUT_TP + N_TP],
    }
    acts = out[:, OUT_ACT:OUT_ACT + 4].astype(jnp.int32)
    action = {
        "action_type": acts[:, 0],
        "target_entity": acts[:, 1],
        "target_card": acts[:, 2],
        "target_position": acts[:, 3],
    }
    return action, logit


# --------------------------------- main ---------------------------------------
if __name__ == "__main__":
    key = jax.random.PRNGKey(0)
    k_ent, k_hand, k_min, k_hero, k_sec, k_par = jax.random.split(key, 6)

    entities_feat = jax.random.normal(k_ent, (B, N_ENT, D_ENT), jnp.float32)
    hand_card_feat = jax.random.normal(k_hand, (B, N_HAND, D_HAND), jnp.float32)
    minions_feat = jax.random.normal(k_min, (B, N_MIN, D_MIN), jnp.float32)
    heros_feat = jax.random.normal(k_hero, (B, N_HERO, D_HERO), jnp.float32)
    secret_value = jax.random.normal(k_sec, (B, 2), jnp.float32)  # unused

    # deterministic masks (True = allowed), shapes follow update_action_mask()
    mask = {
        "action_type": jnp.ones((B, N_AT), jnp.bool_).at[:, 5].set(False),
        "target_entity": jnp.ones((B, N_TE), jnp.bool_),
        "target_card": jnp.ones((B, N_TC), jnp.bool_),
        "target_position": jnp.ones((B, N_TP), jnp.bool_).at[:, 6].set(False),
    }

    params = init_params(k_par)
    param_slab = pack_params(params)          # packed ONCE on the host

    action, logit = policy_forward(entities_feat, hand_card_feat, minions_feat,
                                   heros_feat, secret_value, mask, param_slab)
    jax.block_until_ready((action, logit))

    # basic sanity
    assert logit["action_type"].shape == (B, N_AT)
    assert logit["target_entity"].shape == (B, N_TE)
    assert logit["target_card"].shape == (B, N_TC)
    assert logit["target_position"].shape == (B, N_TP)
    assert action["action_type"].dtype == jnp.int32
    assert bool(jnp.all(action["action_type"] != 5))        # masked action never picked
    assert bool(jnp.all(action["target_position"] != 6))    # masked position never picked
    assert bool(jnp.all(jnp.isfinite(logit["action_type"])))

    # TODO(synk): select_forward / update_action_mask operate on Python dicts of
    # available actions on the host; they are host-side control logic, not kernel work.

    print("KERNEL_OK")
</pallas_src>

<mosaic_0001>
module attributes {stable_mosaic.version = 11 : i64} {
  func.func @_policy_kernel(%arg0: memref<2x256xbf16, #tpu.memory_space<vmem>>, %arg1: memref<168x128xbf16, #tpu.memory_space<vmem>>, %arg2: memref<2x128xf32, #tpu.memory_space<vmem>>) attributes {dimension_semantics = [], scalar_prefetch = 0 : i64, scratch_operands = 0 : i64, tpu.core_type = #tpu.core_type<tc>} {
    %cst = arith.constant 0.000000e+00 : f32
    %0 = vector.broadcast %cst : f32 to vector<2x128xf32>
    %c0 = arith.constant 0 : index
    %c0_0 = arith.constant 0 : index
    %1 = vector.load %arg2[%c0, %c0_0] : memref<2x128xf32, #tpu.memory_space<vmem>>, vector<2x128xf32>
    tpu.vector_store %arg2[%c0, %c0_0], %0 {strides = array<i32>} : memref<2x128xf32, #tpu.memory_space<vmem>>, vector<2x128xf32>,
    %c0_1 = arith.constant 0 : index
    %c0_2 = arith.constant 0 : index
    %2 = vector.load %arg1[%c0_1, %c0_2] : memref<168x128xbf16, #tpu.memory_space<vmem>>, vector<64x128xbf16>
    %c64 = arith.constant 64 : index
    %c0_3 = arith.constant 0 : index
    %3 = vector.load %arg1[%c64, %c0_3] : memref<168x128xbf16, #tpu.memory_space<vmem>>, vector<32x128xbf16>
    %c96 = arith.constant 96 : index
    %c0_4 = arith.constant 0 : index
    %4 = vector.load %arg1[%c96, %c0_4] : memref<168x128xbf16, #tpu.memory_space<vmem>>, vector<64x128xbf16>
    %c160 = arith.constant 160 : index
    %c0_5 = arith.constant 0 : index
    %5 = vector.load %arg1[%c160, %c0_5] : memref<168x128xbf16, #tpu.memory_space<vmem>>, vector<8x128xbf16>
    %6 = arith.extf %5 : vector<8x128xbf16> to vector<8x128xf32>
    %7 = vector.extract_strided_slice %2 {offsets = [0, 0], sizes = [64, 32], strides = [1, 1]} : vector<64x128xbf16> to vector<64x32xbf16>
    %8 = vector.extract_strided_slice %2 {offsets = [0, 32], sizes = [32, 32], strides = [1, 1]} : vector<64x128xbf16> to vector<32x32xbf16>
    %9 = vector.extract_strided_slice %2 {offsets = [32, 32], sizes = [32, 32], strides = [1, 1]} : vector<64x128xbf16> to vector<32x32xbf16>
    %10 = vector.extract_strided_slice %2 {offsets = [0, 64], sizes = [64, 64], strides = [1, 1]} : vector<64x128xbf16> to vector<64x64xbf16>
    %11 = vector.extract_strided_slice %3 {offsets = [0, 0], sizes = [32, 64], strides = [1, 1]} : vector<32x128xbf16> to vector<32x64xbf16>
    %12 = vector.extract_strided_slice %3 {offsets = [0, 64], sizes = [32, 21], strides = [1, 1]} : vector<32x128xbf16> to vector<32x21xbf16>
    %13 = vector.extract_strided_slice %3 {offsets = [0, 96], sizes = [32, 17], strides = [1, 1]} : vector<32x128xbf16> to vector<32x17xbf16>
    %14 = vector.extract_strided_slice %4 {offsets = [0, 0], sizes = [24, 32], strides = [1, 1]} : vector<64x128xbf16> to vector<24x32xbf16>
    %15 = vector.extract_strided_slice %4 {offsets = [0, 32], sizes = [64, 10], strides = [1, 1]} : vector<64x128xbf16> to vector<64x10xbf16>
    %16 = vector.extract_strided_slice %6 {offsets = [0, 0], sizes = [1, 32], strides = [1, 1]} : vector<8x128xf32> to vector<1x32xf32>
    %17 = vector.extract_strided_slice %6 {offsets = [1, 0], sizes = [1, 21], strides = [1, 1]} : vector<8x128xf32> to vector<1x21xf32>
    %18 = vector.extract_strided_slice %6 {offsets = [2, 0], sizes = [1, 32], strides = [1, 1]} : vector<8x128xf32> to vector<1x32xf32>
    %19 = vector.extract_strided_slice %6 {offsets = [3, 0], sizes = [1, 17], strides = [1, 1]} : vector<8x128xf32> to vector<1x17xf32>
    %20 = vector.extract_strided_slice %6 {offsets = [4, 0], sizes = [1, 64], strides = [1, 1]} : vector<8x128xf32> to vector<1x64xf32>
    %21 = vector.extract_strided_slice %6 {offsets = [5, 0], sizes = [1, 10], strides = [1, 1]} : vector<8x128xf32> to vector<1x10xf32>
    %c0_6 = arith.constant 0 : index
    %c0_7 = arith.constant 0 : index
    %22 = vector.load %arg0[%c0_6, %c0_7] : memref<2x256xbf16, #tpu.memory_space<vmem>>, vector<2x64xbf16>
    %cst_8 = arith.constant dense<0.000000e+00> : vector<2x32xf32>
    %23 = tpu.matmul %22, %7, %cst_8 {dimension_numbers = #tpu.dot_dimension_numbers<[1], [0], [0], [1], [0, 0, 1, 1], [], []>} : vector<2x64xbf16>, vector<64x32xbf16>, vector<2x32xf32> -> vector<2x32xf32>
    %24 = vector.broadcast %16 : vector<1x32xf32> to vector<2x32xf32>
    %25 = arith.addf %23, %24 : vector<2x32xf32>
    %cst_9 = arith.constant 0.000000e+00 : f32
    %26 = vector.broadcast %cst_9 : f32 to vector<2x32xf32>
    %27 = arith.maximumf %25, %26 : vector<2x32xf32>
    %28 = arith.truncf %27 : vector<2x32xf32> to vector<2x32xbf16>
    %cst_10 = arith.constant dense<0.000000e+00> : vector<2x21xf32>
    %29 = tpu.matmul %28, %12, %cst_10 {dimension_numbers = #tpu.dot_dimension_numbers<[1], [0], [0], [1], [0, 0, 1, 1], [], []>} : vector<2x32xbf16>, vector<32x21xbf16>, vector<2x21xf32> -> vector<2x21xf32>
    %30 = vector.broadcast %17 : vector<1x21xf32> to vector<2x21xf32>
    %31 = arith.addf %29, %30 : vector<2x21xf32>
    %c0_11 = arith.constant 0 : index
    %c128 = arith.constant 128 : index
    %32 = vector.load %arg0[%c0_11, %c128] : memref<2x256xbf16, #tpu.memory_space<vmem>>, vector<2x21xbf16>
    %cst_12 = arith.constant 0.000000e+00 : bf16
    %33 = vector.broadcast %cst_12 : bf16 to vector<2x21xbf16>
    %34 = arith.cmpf ogt, %32, %33 : vector<2x21xbf16>
    %cst_13 = arith.constant -1.000000e+09 : f32
    %35 = vector.broadcast %cst_13 : f32 to vector<2x21xf32>
    %36 = arith.select %34, %31, %35 : vector<2x21xi1>, vector<2x21xf32>
    %37 = tpu.iota {dimensions = array<i32: 1>} : vector<2x21xi32>
    %cst_14 = arith.constant dense<0xFF800000> : vector<2xf32>
    %38 = vector.multi_reduction <maximumf>, %36, %cst_14 [1] : vector<2x21xf32> to vector<2xf32>
    %39 = vector.shape_cast %38 : vector<2xf32> to vector<2x1xf32>
    %40 = vector.broadcast %39 : vector<2x1xf32> to vector<2x21xf32>
    %41 = arith.cmpf oge, %36, %40 : vector<2x21xf32>
    %c21_i32 = arith.constant 21 : i32
    %42 = vector.broadcast %c21_i32 : i32 to vector<2x21xi32>
    %43 = arith.select %41, %37, %42 : vector<2x21xi1>, vector<2x21xi32>
    %cst_15 = arith.constant dense<2147483647> : vector<2xi32>
    %44 = vector.multi_reduction <minsi>, %43, %cst_15 [1] : vector<2x21xi32> to vector<2xi32>
    %45 = vector.shape_cast %44 : vector<2xi32> to vector<2x1xi32>
    %46 = math.tanh %36 : vector<2x21xf32>
    %c0_16 = arith.constant 0 : index
    %c0_17 = arith.constant 0 : index
    %47 = vector.load %arg2[%c0_16, %c0_17] : memref<2x128xf32, #tpu.memory_space<vmem>>, vector<2x21xf32>
    tpu.vector_store %arg2[%c0_16, %c0_17], %46 {strides = array<i32>} : memref<2x128xf32, #tpu.memory_space<vmem>>, vector<2x21xf32>,
    %48 = arith.sitofp %45 : vector<2x1xi32> to vector<2x1xf32>
    %c0_18 = arith.constant 0 : index
    %c48 = arith.constant 48 : index
    %49 = vector.load %arg2[%c0_18, %c48] : memref<2x128xf32, #tpu.memory_space<vmem>>, vector<2x1xf32>
    tpu.vector_store %arg2[%c0_18, %c48], %48 {strides = array<i32>} : memref<2x128xf32, #tpu.memory_space<vmem>>, vector<2x1xf32>,
    %50 = tpu.iota {dimensions = array<i32: 1>} : vector<2x24xi32>
    %51 = vector.broadcast %45 : vector<2x1xi32> to vector<2x24xi32>
    %52 = arith.cmpi eq, %50, %51 : vector<2x24xi32>
    %53 = arith.extui %52 : vector<2x24xi1> to vector<2x24xi32>
    %54 = arith.sitofp %53 : vector<2x24xi32> to vector<2x24xf32>
    %55 = arith.truncf %54 : vector<2x24xf32> to vector<2x24xbf16>
    %cst_19 = arith.constant dense<0.000000e+00> : vector<2x32xf32>
    %56 = tpu.matmul %55, %14, %cst_19 {dimension_numbers = #tpu.dot_dimension_numbers<[1], [0], [0], [1], [0, 0, 1, 1], [], []>} : vector<2x24xbf16>, vector<24x32xbf16>, vector<2x32xf32> -> vector<2x32xf32>
    %57 = arith.addf %27, %56 : vector<2x32xf32>
    %c0_20 = arith.constant 0 : index
    %c64_21 = arith.constant 64 : index
    %58 = vector.load %arg0[%c0_20, %c64_21] : memref<2x256xbf16, #tpu.memory_space<vmem>>, vector<2x32xbf16>
    %59 = arith.truncf %57 : vector<2x32xf32> to vector<2x32xbf16>
    %cst_22 = arith.constant dense<0.000000e+00> : vector<2x32xf32>
    %60 = tpu.matmul %59, %8, %cst_22 {dimension_numbers = #tpu.dot_dimension_numbers<[1], [0], [0], [1], [0, 0, 1, 1], [], []>} : vector<2x32xbf16>, vector<32x32xbf16>, vector<2x32xf32> -> vector<2x32xf32>
    %cst_23 = arith.constant dense<0.000000e+00> : vector<2x32xf32>
    %61 = tpu.matmul %58, %9, %cst_23 {dimension_numbers = #tpu.dot_dimension_numbers<[1], [0], [0], [1], [0, 0, 1, 1], [], []>} : vector<2x32xbf16>, vector<32x32xbf16>, vector<2x32xf32> -> vector<2x32xf32>
    %62 = arith.addf %60, %61 : vector<2x32xf32>
    %63 = vector.broadcast %18 : vector<1x32xf32> to vector<2x32xf32>
    %64 = arith.addf %62, %63 : vector<2x32xf32>
    %cst_24 = arith.constant 0.000000e+00 : f32
    %65 = vector.broadcast %cst_24 : f32 to vector<2x32xf32>
    %66 = arith.maximumf %64, %65 : vector<2x32xf32>
    %67 = arith.truncf %66 : vector<2x32xf32> to vector<2x32xbf16>
    %cst_25 = arith.constant dense<0.000000e+00> : vector<2x17xf32>
    %68 = tpu.matmul %67, %13, %cst_25 {dimension_numbers = #tpu.dot_dimension_numbers<[1], [0], [0], [1], [0, 0, 1, 1], [], []>} : vector<2x32xbf16>, vector<32x17xbf16>, vector<2x17xf32> -> vector<2x17xf32>
    %69 = vector.broadcast %19 : vector<1x17xf32> to vector<2x17xf32>
    %70 = arith.addf %68, %69 : vector<2x17xf32>
    %c0_26 = arith.constant 0 : index
    %c149 = arith.constant 149 : index
    %71 = vector.load %arg0[%c0_26, %c149] : memref<2x256xbf16, #tpu.memory_space<vmem>>, vector<2x17xbf16>
    %cst_27 = arith.constant 0.000000e+00 : bf16
    %72 = vector.broadcast %cst_27 : bf16 to vector<2x17xbf16>
    %73 = arith.cmpf ogt, %71, %72 : vector<2x17xbf16>
    %cst_28 = arith.constant -1.000000e+09 : f32
    %74 = vector.broadcast %cst_28 : f32 to vector<2x17xf32>
    %75 = arith.select %73, %70, %74 : vector<2x17xi1>, vector<2x17xf32>
    %76 = tpu.iota {dimensions = array<i32: 1>} : vector<2x17xi32>
    %cst_29 = arith.constant dense<0xFF800000> : vector<2xf32>
    %77 = vector.multi_reduction <maximumf>, %75, %cst_29 [1] : vector<2x17xf32> to vector<2xf32>
    %78 = vector.shape_cast %77 : vector<2xf32> to vector<2x1xf32>
    %79 = vector.broadcast %78 : vector<2x1xf32> to vector<2x17xf32>
    %80 = arith.cmpf oge, %75, %79 : vector<2x17xf32>
    %c17_i32 = arith.constant 17 : i32
    %81 = vector.broadcast %c17_i32 : i32 to vector<2x17xi32>
    %82 = arith.select %80, %76, %81 : vector<2x17xi1>, vector<2x17xi32>
    %cst_30 = arith.constant dense<2147483647> : vector<2xi32>
    %83 = vector.multi_reduction <minsi>, %82, %cst_30 [1] : vector<2x17xi32> to vector<2xi32>
    %84 = vector.shape_cast %83 : vector<2xi32> to vector<2x1xi32>
    %85 = math.tanh %75 : vector<2x17xf32>
    %c0_31 = arith.constant 0 : index
    %c21 = arith.constant 21 : index
    %86 = vector.load %arg2[%c0_31, %c21] : memref<2x128xf32, #tpu.memory_space<vmem>>, vector<2x17xf32>
    tpu.vector_store %arg2[%c0_31, %c21], %85 {strides = array<i32>} : memref<2x128xf32, #tpu.memory_space<vmem>>, vector<2x17xf32>,
    %87 = arith.sitofp %84 : vector<2x1xi32> to vector<2x1xf32>
    %c0_32 = arith.constant 0 : index
    %c49 = arith.constant 49 : index
    %88 = vector.load %arg2[%c0_32, %c49] : memref<2x128xf32, #tpu.memory_space<vmem>>, vector<2x1xf32>
    tpu.vector_store %arg2[%c0_32, %c49], %87 {strides = array<i32>} : memref<2x128xf32, #tpu.memory_space<vmem>>, vector<2x1xf32>,
    %c0_33 = arith.constant 0 : index
    %c64_34 = arith.constant 64 : index
    %89 = vector.load %arg0[%c0_33, %c64_34] : memref<2x256xbf16, #tpu.memory_space<vmem>>, vector<2x64xbf16>
    %90 = arith.truncf %66 : vector<2x32xf32> to vector<2x32xbf16>
    %cst_35 = arith.constant dense<0.000000e+00> : vector<2x64xf32>
    %91 = tpu.matmul %90, %11, %cst_35 {dimension_numbers = #tpu.dot_dimension_numbers<[1], [0], [0], [1], [0, 0, 1, 1], [], []>} : vector<2x32xbf16>, vector<32x64xbf16>, vector<2x64xf32> -> vector<2x64xf32>
    %cst_36 = arith.constant dense<0.000000e+00> : vector<2x64xf32>
    %92 = tpu.matmul %89, %10, %cst_36 {dimension_numbers = #tpu.dot_dimension_numbers<[1], [0], [0], [1], [0, 0, 1, 1], [], []>} : vector<2x64xbf16>, vector<64x64xbf16>, vector<2x64xf32> -> vector<2x64xf32>
    %93 = arith.addf %91, %92 : vector<2x64xf32>
    %94 = vector.broadcast %20 : vector<1x64xf32> to vector<2x64xf32>
    %95 = arith.addf %93, %94 : vector<2x64xf32>
    %cst_37 = arith.constant 0.000000e+00 : f32
    %96 = vector.broadcast %cst_37 : f32 to vector<2x64xf32>
    %97 = arith.maximumf %95, %96 : vector<2x64xf32>
    %98 = arith.truncf %97 : vector<2x64xf32> to vector<2x64xbf16>
    %cst_38 = arith.constant dense<0.000000e+00> : vector<2x10xf32>
    %99 = tpu.matmul %98, %15, %cst_38 {dimension_numbers = #tpu.dot_dimension_numbers<[1], [0], [0], [1], [0, 0, 1, 1], [], []>} : vector<2x64xbf16>, vector<64x10xbf16>, vector<2x10xf32> -> vector<2x10xf32>
    %100 = vector.broadcast %21 : vector<1x10xf32> to vector<2x10xf32>
    %101 = arith.addf %99, %100 : vector<2x10xf32>
    %c0_39 = arith.constant 0 : index
    %c166 = arith.constant 166 : index
    %102 = vector.load %arg0[%c0_39, %c166] : memref<2x256xbf16, #tpu.memory_space<vmem>>, vector<2x3xbf16>
    %c0_40 = arith.constant 0 : index
    %c169 = arith.constant 169 : index
    %103 = vector.load %arg0[%c0_40, %c169] : memref<2x256xbf16, #tpu.memory_space<vmem>>, vector<2x7xbf16>
    %104 = vector.extract_strided_slice %101 {offsets = [0, 0], sizes = [2, 3], strides = [1, 1]} : vector<2x10xf32> to vector<2x3xf32>
    %cst_41 = arith.constant 0.000000e+00 : bf16
    %105 = vector.broadcast %cst_41 : bf16 to vector<2x3xbf16>
    %106 = arith.cmpf ogt, %102, %105 : vector<2x3xbf16>
    %cst_42 = arith.constant -1.000000e+09 : f32
    %107 = vector.broadcast %cst_42 : f32 to vector<2x3xf32>
    %108 = arith.select %106, %104, %107 : vector<2x3xi1>, vector<2x3xf32>
    %109 = tpu.iota {dimensions = array<i32: 1>} : vector<2x3xi32>
    %cst_43 = arith.constant dense<0xFF800000> : vector<2xf32>
    %110 = vector.multi_reduction <maximumf>, %108, %cst_43 [1] : vector<2x3xf32> to vector<2xf32>
    %111 = vector.shape_cast %110 : vector<2xf32> to vector<2x1xf32>
    %112 = vector.broadcast %111 : vector<2x1xf32> to vector<2x3xf32>
    %113 = arith.cmpf oge, %108, %112 : vector<2x3xf32>
    %c3_i32 = arith.constant 3 : i32
    %114 = vector.broadcast %c3_i32 : i32 to vector<2x3xi32>
    %115 = arith.select %113, %109, %114 : vector<2x3xi1>, vector<2x3xi32>
    %cst_44 = arith.constant dense<2147483647> : vector<2xi32>
    %116 = vector.multi_reduction <minsi>, %115, %cst_44 [1] : vector<2x3xi32> to vector<2xi32>
    %117 = vector.shape_cast %116 : vector<2xi32> to vector<2x1xi32>
    %118 = vector.extract_strided_slice %101 {offsets = [0, 3], sizes = [2, 7], strides = [1, 1]} : vector<2x10xf32> to vector<2x7xf32>
    %cst_45 = arith.constant 0.000000e+00 : bf16
    %119 = vector.broadcast %cst_45 : bf16 to vector<2x7xbf16>
    %120 = arith.cmpf ogt, %103, %119 : vector<2x7xbf16>
    %cst_46 = arith.constant -1.000000e+09 : f32
    %121 = vector.broadcast %cst_46 : f32 to vector<2x7xf32>
    %122 = arith.select %120, %118, %121 : vector<2x7xi1>, vector<2x7xf32>
    %123 = tpu.iota {dimensions = array<i32: 1>} : vector<2x7xi32>
    %cst_47 = arith.constant dense<0xFF800000> : vector<2xf32>
    %124 = vector.multi_reduction <maximumf>, %122, %cst_47 [1] : vector<2x7xf32> to vector<2xf32>
    %125 = vector.shape_cast %124 : vector<2xf32> to vector<2x1xf32>
    %126 = vector.broadcast %125 : vector<2x1xf32> to vector<2x7xf32>
    %127 = arith.cmpf oge, %122, %126 : vector<2x7xf32>
    %c7_i32 = arith.constant 7 : i32
    %128 = vector.broadcast %c7_i32 : i32 to vector<2x7xi32>
    %129 = arith.select %127, %123, %128 : vector<2x7xi1>, vector<2x7xi32>
    %cst_48 = arith.constant dense<2147483647> : vector<2xi32>
    %130 = vector.multi_reduction <minsi>, %129, %cst_48 [1] : vector<2x7xi32> to vector<2xi32>
    %131 = vector.shape_cast %130 : vector<2xi32> to vector<2x1xi32>
    %132 = math.tanh %108 : vector<2x3xf32>
    %c0_49 = arith.constant 0 : index
    %c38 = arith.constant 38 : index
    %133 = vector.load %arg2[%c0_49, %c38] : memref<2x128xf32, #tpu.memory_space<vmem>>, vector<2x3xf32>
    tpu.vector_store %arg2[%c0_49, %c38], %132 {strides = array<i32>} : memref<2x128xf32, #tpu.memory_space<vmem>>, vector<2x3xf32>,
    %134 = math.tanh %122 : vector<2x7xf32>
    %c0_50 = arith.constant 0 : index
    %c41 = arith.constant 41 : index
    %135 = vector.load %arg2[%c0_50, %c41] : memref<2x128xf32, #tpu.memory_space<vmem>>, vector<2x7xf32>
    tpu.vector_store %arg2[%c0_50, %c41], %134 {strides = array<i32>} : memref<2x128xf32, #tpu.memory_space<vmem>>, vector<2x7xf32>,
    %136 = arith.sitofp %117 : vector<2x1xi32> to vector<2x1xf32>
    %c0_51 = arith.constant 0 : index
    %c50 = arith.constant 50 : index
    %137 = vector.load %arg2[%c0_51, %c50] : memref<2x128xf32, #tpu.memory_space<vmem>>, vector<2x1xf32>
    tpu.vector_store %arg2[%c0_51, %c50], %136 {strides = array<i32>} : memref<2x128xf32, #tpu.memory_space<vmem>>, vector<2x1xf32>,
    %138 = arith.sitofp %131 : vector<2x1xi32> to vector<2x1xf32>
    %c0_52 = arith.constant 0 : index
    %c51 = arith.constant 51 : index
    %139 = vector.load %arg2[%c0_52, %c51] : memref<2x128xf32, #tpu.memory_space<vmem>>, vector<2x1xf32>
    tpu.vector_store %arg2[%c0_52, %c51], %138 {strides = array<i32>} : memref<2x128xf32, #tpu.memory_space<vmem>>, vector<2x1xf32>,
    return
  }
}

</mosaic_0001>

<bundles_post_ra>
// kernel: policy_forward.1
= control target key start
LH: loop header
LB: loop body
LE: loop exit
PB: predicated region body
PF: predicated region fallthrough
CT: control target
= control target key end

     0   :  { %v941_v0 = vmov 0.0   ;;  %vm942_vm0 = vmmov 0   ;;  %s943_s19 = smov 64   ;;  %vm66_vm1 = vcmask 523264   ;;  %v38_v10 = vlaneseq  ;;  %s945_s8 = smov 96   ;;  %s1195_s1 = inlined_call_operand.vmem [shape: bf16[168,128], index: 1, kind: input, shape index: {}]   ;;  %s1196_s0 = inlined_call_operand.vmem [shape: bf16[2,256], index: 0, kind: input, shape index: {}]   ;;  %s1197_s2 = inlined_call_operand.vmem [shape: f32[2,128], index: 2, kind: output, shape index: {}]  }
   0x1   :  { %827 = vmatprep.subr.bf16.mxu0 %v941_v0  ;;  %v973_v1 = vld [vmem:[%s1195_s1 + $0x18] sm:$0xff]   ;;  %835 = vmatprep.mubr.msk.bf16.mxu0 %vm942_vm0, %v941_v0  ;;  %v984_v2 = vld [vmem:[%s1195_s1 + $0x10] sm:$0xff]   ;;  %v990_v3 = vld [vmem:[%s1195_s1 + $0x28] sm:$0xff]   ;;  %vm132_vm2 = vcmask 261120   ;;  %14 = vst [vmem:[%s1197_s2] sm:$0x3] %v941_v0  ;;  %v944_v25 = vmov 0  }
   0x2   :  { %839 = vmatprep.subr.bf16.mxu1 %v941_v0  ;;  %843 = vmatprep.mubr.msk.bf16.mxu1 %vm942_vm0, %v941_v0  ;;  %v996_v4 = vld [vmem:[%s1195_s1 + $0x8] sm:$0xff]   ;;  %v1001_v5 = vld [vmem:[%s1195_s1 + $0x20] sm:$0xff]   ;;  %v1025_v11 = vshrl.u32 %v38_v10, 7  ;;  %v35_v12 = vld [vmem:[%s1195_s1 + $0x50] sm:$0xf]  ;;  %vm184_vm5 = vcmask 164864  }
   0x3   :  { %828 = vmatpush3.bf16.msra.mxu0 %v973_v1  ;;  %128 = vrot.lane.b32.xlu0 %v990_v3, %s943_s19  ;;  %v1010_v6 = vld [vmem:[%s1195_s1] sm:$0xff]   ;;  %v1030_v13 = vunpack.c.l.bf16 %v35_v12  ;;  %v1054_v37 = vand.u32 127, %v38_v10  ;;  %v1060_v47 = vld [vmem:[%s1195_s1 + $0x38] sm:$0xf]  ;;  %vm227_vm8 = vcmask 1043456   ;;  %v1068_v50 = vld [vmem:[%s1195_s1 + $0x30] sm:$0xff]  }
   0x4   :  { %829 = vmatprep.subr.bf16.mxu0 %v941_v0  ;;  %v37_v7 = vld [vmem:[%s1196_s0] sm:$0x1]  ;;  %v40_v14 = vsub.s32 0, %v1025_v11  ;;  %v176_v23 = vld [vmem:[%s1196_s0 + $0x1] sm:$0x1]  ;;  %v114_v24 = vsub.s32 1, %v1025_v11  ;;  %v781_v48 = vcombine.low %v1060_v47, %v1060_v47 }
   0x5   :  { %vm177_vm3 = vcmp.gt.bf16.partialorder %v176_v23, 0  ;;  %v946_v51 = vmov 1966171168   ;;  %vm208_vm9 = vcmask 394624   ;;  %vm223_vm11 = vcmask 195584   ;;  %s947_s13 = smov 32  }
   0x6   :  { %v41_v15 = vrot.slane %v1030_v13, %v40_v14  ;;  %v178_v26 = vsel %vm177_vm3, 65537, %v944_v25  ;;  %v115_v28 = vrot.slane %v1030_v13, %v114_v24  ;;  %v229_v49 = vsel %vm227_vm8, %v781_v48, 0  ;;  %v783_v54 = vld.sshfl [vmem:[%s1196_s0] sm:$0x1 pattern:$0x75316420] }
   0x7   :  { %830 = vmatpush3.bf16.msra.mxu0 %v984_v2  ;;  %126 = vrot.lane.b32.xlu0 %v1001_v5, %s943_s19  ;;  %v179_v27 = vunpack.c.l.b16 %v178_v26  ;;  %v283_v52 = vunpack.c.l.s4 %v946_v51  ;;  %s950_s24 = smov 90   ;;  %s952_s25 = smov 21  }
   0x8   :  { %831 = vmatprep.subr.bf16.mxu0 %v941_v0  ;;  %s953_s30 = smov 38  }
   0x9   :  { %vm180_vm4 = vcmp.ne.s32.totalorder %v179_v27, 0  ;;  %v284_v53 = vunpack.c.0.s8 %v283_v52 }
   0xb   :  { %832 = vmatpush3.bf16.msra.mxu0 %v996_v4  ;;  %v287_v55 = vsub.s32 %v284_v53, %v1025_v11 }
   0xc   :  { %833 = vmatprep.subr.bf16.mxu0 %v941_v0 }
   0xd   :  { %v288_v56 = vrot.slane %v783_v54, %v287_v55 }
   0xf   :  { %834 = vmatpush3.bf16.msra.mxu0 %v1010_v6 }
  0x10   :  { %871 = vmatprep.subr.bf16.mxu0 %v941_v0 }
  0x12   :  { %836 = vmatmul.mubr.msk.bf16.vlgmr.msra.gmra.mxu0 %vm66_vm1, %v37_v7 }
  0x13   :  { %875 = vmatprep.mubr.msk.bf16.mxu0 %vm942_vm0, %v941_v0 }
  0x75   :  { %v129_v8 = vpop.permute.xlu0 %128 }
  0x76   :  { %840 = vmatpush3.bf16.msra.mxu1 %v129_v8 }
  0x77   :  { %841 = vmatprep.subr.bf16.mxu1 %v941_v0 }
  0x79   :  { %v127_v9 = vpop.permute.xlu0 %126 }
  0x7a   :  { %842 = vmatpush3.bf16.msra.mxu1 %v127_v9 }
  0x7b   :  { %847 = vmatprep.subr.bf16.mxu1 %v941_v0 }
  0xd2   :  { %v104_v16 = vpop.f32.mrf.mxu0 }
  0xd3   :  { %v105_v17 = vadd.f32 %v104_v16, %v41_v15 }
  0xd4   :  { %v837_v18 = vpop.f32.mrf.mxu0 }
  0xd5   :  { %v1034_v19 = vmax.f32 %v105_v17, 0.0 }
  0xd6   :  { %v107_v20 = vpop.f32.mrf.mxu0 }
  0xd7   :  { %v111_v21 = vpack.c.bf16 %v1034_v19, %v1034_v19 }
  0xd8   :  { %v838_v22 = vpop.f32.mrf.mxu0 }
  0xd9   :  { %844 = vmatmul.mubr.msk.bf16.vlgmr.msra.gmra.mxu1 %vm132_vm2, %v111_v21 }
  0xda   :  { %851 = vmatprep.mubr.msk.bf16.mxu1 %vm942_vm0, %v941_v0  ;;  %848 = vmatpush3.bf16.msra.mxu1 %v229_v49 }
  0xdb   :  { %849 = vmatprep.subr.bf16.mxu1 %v941_v0 }
  0xde   :  { %850 = vmatpush3.bf16.msra.mxu1 %v1068_v50 }
  0xdf   :  { %855 = vmatprep.subr.bf16.mxu1 %v941_v0 }
 0x199   :  { %v170_v29 = vpop.f32.mrf.mxu1 }
 0x19a   :  { %v171_v30 = vadd.f32 %v170_v29, %v115_v28  ;;  %v932_v29 = vld [vmem:[%s1195_s1 + $0x48] sm:$0xff]  }
 0x19b   :  { %v845_v31 = vpop.f32.mrf.mxu1 }
 0x19c   :  { %v181_v32 = vsel %vm180_vm4, %v171_v30, -1e+09  ;;  %v30_v30 = vld [vmem:[%s1195_s1 + $0x3c] sm:$0xf]  ;;  %v449_v31 = vld [vmem:[%s1196_s0 + $0x1] sm:$0x1] }
 0x19d   :  { %v173_v33 = vpop.f32.mrf.mxu1  ;;  %v185_v34 = vsel %vm184_vm5, %v181_v32, -inf  ;;  %935 = vtanh.f32 %v181_v32  ;;  %vm450_vm12 = vcmp.gt.bf16.partialorder %v449_v31, 0 }
 0x19e   :  { %186 = vmax.xlane.f32.xlu1 %v185_v34  ;;  %v790_v33 = vcombine.low %v1060_v47, %v30_v30  ;;  %v451_v34 = vsel %vm450_vm12, 65537, %v944_v25  ;;  %vm495_vm12 = vcmask 402824  }
 0x19f   :  { %v846_v35 = vpop.f32.mrf.mxu1 }
 0x1a0   :  { %v948_v35 = vmov 1983009808  }
 0x1aa   :  { %v936_v36 = vpop.eup %935 }
 0x1ab   :  { %206 = vst.msk [vmem:[%s1197_s2] sm:$0x3] %vm184_vm5, %v936_v36  ;;  %v456_v36 = vunpack.c.l.s4 %v948_v35 }
 0x227   :  { %v187_v38 = vpop.xlane.xlu1 %186 }
 0x228   :  { %vm188_vm6 = vcmp.ge.f32.partialorder %v181_v32, %v187_v38  ;;  %v934_v32 = vld [vmem:[%s1195_s1 + $0x40] sm:$0xff]   ;;  %v452_v38 = vunpack.c.l.b16 %v451_v34  ;;  %s949_s1 = smov 107  }
 0x229   :  { %v189_v39 = vsel %vm188_vm6, %v1054_v37, 21 }
 0x22a   :  { %v190_v40 = vsel %vm184_vm5, %v189_v39, 2147483647  ;;  %v457_v39 = vunpack.c.0.s8 %v456_v36  ;;  %vm453_vm13 = vcmp.ne.s32.totalorder %v452_v38, 0  ;;  %vm708_vm5 = vcmask 17408  }
 0x22b   :  { %v192_v41 = vshra.s32 %v190_v40, 16  ;;  %v191_v43 = vand.u32 65535, %v190_v40  ;;  %v454_v40 = vsel %vm453_vm13, 1, %v944_v25  ;;  %vm757_vm13 = vcmask 329008  }
 0x22d   :  { %v194_v42 = vcvt.s32.f32 %v192_v41  ;;  %v193_v45 = vcvt.s32.f32 %v191_v43  ;;  %v460_v41 = vsub.s32 %v457_v39, %v1025_v11  ;;  %v391_v43 = vsub.s32 2, %v1025_v11 }
 0x22f   :  { %195 = vmin.xlane.f32.xlu1 %v194_v42 }
 0x240   :  { %293 = vrot.lane.b32.xlu1 %v973_v1, %s945_s8 }
 0x244   :  { %291 = vrot.lane.b32.xlu1 %v984_v2, %s945_s8 }
 0x248   :  { %289 = vrot.lane.b32.xlu1 %v288_v56, %s943_s19 }
 0x24c   :  { %342 = vrot.lane.b32.xlu1 %v996_v4, %s945_s8 }
 0x250   :  { %340 = vrot.lane.b32.xlu1 %v1010_v6, %s945_s8 }
 0x254   :  { %521 = vrot.lane.b32.xlu1 %v973_v1, %s943_s19 }
 0x258   :  { %400 = vrot.lane.b32.xlu1 %v1001_v5, %s947_s13 }
 0x25c   :  { %519 = vrot.lane.b32.xlu1 %v984_v2, %s943_s19 }
 0x260   :  { %517 = vrot.lane.b32.xlu1 %v996_v4, %s943_s19 }
 0x264   :  { %515 = vrot.lane.b32.xlu1 %v1010_v6, %s943_s19 }
 0x268   :  { %642 = vrot.lane.b32.xlu1 %v932_v29, %s945_s8 }
 0x26c   :  { %638 = vrot.lane.b32.xlu1 %v790_v33, %s945_s8 }
 0x2b8   :  { %v196_v44 = vpop.xlane.xlu1 %195 }
 0x2b9   :  { %vm197_vm7 = vcmp.eq.f32.partialorder %v194_v42, %v196_v44  ;;  %v202_v57 = vcvt.f32.s32 %v196_v44  ;;  %v461_v42 = vrot.slane %v454_v40, %v460_v41  ;;  %v392_v44 = vrot.slane %v1030_v13, %v391_v43 }
 0x2ba   :  { %v198_v46 = vsel %vm197_vm7, %v193_v45, inf }
 0x2bb   :  { %199 = vmin.xlane.f32.xlu0 %v198_v46  ;;  %v203_v60 = vshll.u32 %v202_v57, 16  ;;  %462 = vrot.lane.b32.xlu1 %v461_v42, %s949_s1 }
 0x2bc   :  { %v294_v58 = vpop.permute.xlu1 %293 }
 0x2c0   :  { %v292_v63 = vpop.permute.xlu1 %291 }
 0x2c4   :  { %v290_v1 = vpop.permute.xlu1 %289 }
 0x2c8   :  { %v343_v10 = vpop.permute.xlu1 %342 }
 0x2cc   :  { %v341_v12 = vpop.permute.xlu1 %340 }
 0x2d0   :  { %v522_v14 = vpop.permute.xlu1 %521 }
 0x2d1   :  { %402 = vrot.lane.b32.xlu0 %v990_v3, %s947_s13 }
 0x2d4   :  { %v401_v16 = vpop.permute.xlu1 %400 }
 0x2d5   :  { %513 = vrot.lane.b32.xlu0 %v288_v56, %s943_s19 }
 0x2d8   :  { %v520_v6 = vpop.permute.xlu1 %519 }
 0x2d9   :  { %640 = vrot.lane.b32.xlu0 %v934_v32, %s945_s8 }
 0x2dc   :  { %v518_v26 = vpop.permute.xlu1 %517 }
 0x2dd   :  { %636 = vrot.lane.b32.xlu0 %v1068_v50, %s945_s8 }
 0x2e0   :  { %v516_v27 = vpop.permute.xlu1 %515 }
 0x2e4   :  { %v643_v50 = vpop.permute.xlu1 %642 }
 0x2e8   :  { %v639_v57 = vpop.permute.xlu1 %638 }
 0x344   :  { %v200_v59 = vpop.xlane.xlu0 %199 }
 0x345   :  { %v201_v61 = vcvt.f32.s32 %v200_v59  ;;  %v691_v59 = vld [vmem:[%s1196_s0 + $0x1] sm:$0x1]  ;;  %s951_s0 = smov 3  }
 0x346   :  { %vm692_vm14 = vcmp.gt.bf16.partialorder %v691_v59, 0 }
 0x347   :  { %v204_v62 = vadd.s32 %v203_v60, %v201_v61  ;;  %v693_v60 = vsel %vm692_vm14, 65537, %v944_v25  ;;  %vm759_vm14 = vcmask 386376  }
 0x348   :  { %v403_v15 = vpop.permute.xlu0 %402  ;;  %v694_v61 = vunpack.c.l.b16 %v693_v60 }
 0x349   :  { %v207_v7 = vcvt.s32.f32 %v204_v62  ;;  %vm210_vm10 = vcmp.eq.s32.totalorder %v1054_v37, %v204_v62  ;;  %872 = vmatpush3.bf16.msra.mxu0 %v403_v15 }
 0x34a   :  { %v779_v8 = vsel %vm210_vm10, 1.0, %v941_v0  ;;  %873 = vmatprep.subr.bf16.mxu0 %v941_v0  ;;  %vm695_vm15 = vcmp.ne.s32.totalorder %v694_v61, 0 }
 0x34b   :  { %v213_v9 = vpack.c.bf16 %v779_v8, %v779_v8  ;;  %209 = vst.msk [vmem:[%s1197_s2] sm:$0x3] %vm208_vm9, %v207_v7  ;;  %v696_v62 = vsel %vm695_vm15, 1, %v944_v25  ;;  %v398_v7 = vsub.s32 3, %v1025_v11  ;;  %v463_v8 = vpop.permute.xlu1 %462  ;;  %vm762_vm15 = vcmask 411024  }
 0x34c   :  { %v514_v28 = vpop.permute.xlu0 %513 }
 0x34d   :  { %852 = vmatmul.mubr.msk.bf16.vlgmr.msra.gmra.mxu1 %vm223_vm11, %v213_v9  ;;  %874 = vmatpush3.bf16.msra.mxu0 %v401_v16  ;;  %vm492_vm11 = vcmask 304296  }
 0x34e   :  { %856 = vmatpush3.bf16.msra.mxu1 %v294_v58  ;;  %859 = vmatprep.mubr.msk.bf16.mxu1 %vm942_vm0, %v941_v0 }
 0x34f   :  { %857 = vmatprep.subr.bf16.mxu1 %v941_v0  ;;  %891 = vmatprep.subr.bf16.mxu0 %v941_v0 }
 0x350   :  { %v641_v55 = vpop.permute.xlu0 %640 }
 0x352   :  { %858 = vmatpush3.bf16.msra.mxu1 %v292_v63  ;;  %v703_v63 = vrot.slane %v696_v62, %v460_v41 }
 0x353   :  { %863 = vmatprep.subr.bf16.mxu1 %v941_v0 }
 0x354   :  { %v637_v58 = vpop.permute.xlu0 %636  ;;  %704 = vrot.lane.b32.xlu0 %v703_v63, %s950_s24 }
 0x355   :  { %860 = vmatmul.mubr.msk.bf16.vlgmr.msra.gmra.mxu1 %vm132_vm2, %v290_v1 }
 0x356   :  { %864 = vmatpush3.bf16.msra.mxu1 %v343_v10  ;;  %867 = vmatprep.mubr.msk.bf16.mxu1 %vm942_vm0, %v941_v0 }
 0x357   :  { %865 = vmatprep.subr.bf16.mxu1 %v941_v0 }
 0x35a   :  { %866 = vmatpush3.bf16.msra.mxu1 %v341_v12 }
 0x35b   :  { %879 = vmatprep.subr.bf16.mxu1 %v941_v0 }
 0x40d   :  { %v265_v17 = vpop.f32.mrf.mxu1 }
 0x40e   :  { %v271_v2 = vadd.f32 %v265_v17, %v1034_v19 }
 0x40f   :  { %v853_v18 = vpop.f32.mrf.mxu1 }
 0x410   :  { %v273_v20 = vpack.c.bf16 %v271_v2, %v271_v2 }
 0x411   :  { %v268_v21 = vpop.f32.mrf.mxu1 }
 0x412   :  { %868 = vmatmul.mubr.msk.bf16.vlgmr.msra.gmra.mxu1 %vm132_vm2, %v273_v20 }
 0x413   :  { %v854_v4 = vpop.f32.mrf.mxu1  ;;  %880 = vmatpush3.bf16.msra.mxu1 %v522_v14  ;;  %887 = vmatprep.mubr.msk.bf16.mxu1 %vm942_vm0, %v941_v0  ;;  %v614_v14 = vsub.s32 4, %v1025_v11 }
 0x414   :  { %881 = vmatprep.subr.bf16.mxu1 %v941_v0 }
 0x415   :  { %v334_v22 = vpop.f32.mrf.mxu1  ;;  %v615_v17 = vrot.slane %v1030_v13, %v614_v14 }
 0x417   :  { %v861_v23 = vpop.f32.mrf.mxu1  ;;  %882 = vmatpush3.bf16.msra.mxu1 %v520_v6 }
 0x418   :  { %883 = vmatprep.subr.bf16.mxu1 %v941_v0 }
 0x419   :  { %v337_v24 = vpop.f32.mrf.mxu1 }
 0x41a   :  { %v621_v24 = vsub.s32 5, %v1025_v11 }
 0x41b   :  { %v862_v19 = vpop.f32.mrf.mxu1  ;;  %884 = vmatpush3.bf16.msra.mxu1 %v518_v26 }
 0x41c   :  { %885 = vmatprep.subr.bf16.mxu1 %v941_v0  ;;  %v622_v26 = vrot.slane %v1030_v13, %v621_v24 }
 0x41f   :  { %886 = vmatpush3.bf16.msra.mxu1 %v516_v27  ;;  %v705_v27 = vpop.permute.xlu0 %704 }
 0x420   :  { %vm706_vm4 = vcmp.ne.s32.totalorder %v705_v27, 0 }
 0x422   :  { %888 = vmatmul.mubr.msk.bf16.vlgmr.msra.gmra.mxu1 %vm66_vm1, %v514_v28 }
 0x4d2   :  { %v383_v45 = vpop.f32.mrf.mxu1 }
 0x4d3   :  { %v384_v46 = vadd.f32 %v383_v45, %v334_v22 }
 0x4d4   :  { %v869_v47 = vpop.f32.mrf.mxu1 }
 0x4d5   :  { %v393_v48 = vadd.f32 %v392_v44, %v384_v46 }
 0x4d6   :  { %v386_v49 = vpop.f32.mrf.mxu1 }
 0x4d7   :  { %v394_v51 = vmax.f32 %v393_v48, 0.0 }
 0x4d8   :  { %v870_v52 = vpop.f32.mrf.mxu1 }
 0x4d9   :  { %v395_v53 = vpack.c.bf16 %v394_v51, %v394_v51 }
 0x4db   :  { %876 = vmatmul.mubr.msk.bf16.vlgmr.msra.gmra.mxu0 %vm132_vm2, %v395_v53 }
 0x4dc   :  { %892 = vmatpush3.bf16.msra.mxu0 %v990_v3  ;;  %895 = vmatprep.mubr.msk.bf16.mxu0 %vm942_vm0, %v941_v0 }
 0x4dd   :  { %893 = vmatprep.subr.bf16.mxu0 %v941_v0 }
 0x4e0   :  { %894 = vmatpush3.bf16.msra.mxu0 %v1001_v5 }
 0x4e1   :  { %899 = vmatprep.subr.bf16.mxu0 %v941_v0 }
 0x4e2   :  { %v564_v54 = vpop.f32.mrf.mxu1 }
 0x4e3   :  { %896 = vmatmul.mubr.msk.bf16.vlgmr.msra.gmra.mxu0 %vm132_vm2, %v395_v53  ;;  %vm466_vm2 = vcmask 132096  }
 0x4e4   :  { %900 = vmatpush3.bf16.msra.mxu0 %v643_v50  ;;  %907 = vmatprep.mubr.msk.bf16.mxu0 %vm942_vm0, %v941_v0  ;;  %v889_v3 = vpop.f32.mrf.mxu1  ;;  %vm464_vm0 = vcmp.ne.s32.totalorder %v463_v8, 0 }
 0x4e5   :  { %901 = vmatprep.subr.bf16.mxu0 %v941_v0 }
 0x4e6   :  { %v567_v56 = vpop.f32.mrf.mxu1 }
 0x4e8   :  { %902 = vmatpush3.bf16.msra.mxu0 %v641_v55  ;;  %v890_v5 = vpop.f32.mrf.mxu1 }
 0x4e9   :  { %903 = vmatprep.subr.bf16.mxu0 %v941_v0 }
 0x4ec   :  { %904 = vmatpush3.bf16.msra.mxu0 %v639_v57 }
 0x4ed   :  { %905 = vmatprep.subr.bf16.mxu0 %v941_v0  ;;  %v399_v0 = vrot.slane %v1030_v13, %v398_v7 }
 0x4f0   :  { %906 = vmatpush3.bf16.msra.mxu0 %v637_v58 }
 0x59b   :  { %v443_v9 = vpop.f32.mrf.mxu0 }
 0x59c   :  { %v444_v1 = vadd.f32 %v443_v9, %v399_v0 }
 0x59d   :  { %v877_v10 = vpop.f32.mrf.mxu0 }
 0x59e   :  { %v465_v12 = vsel %vm464_vm0, %v444_v1, -1e+09  ;;  %vm765_vm0 = vcmask 419224  }
 0x59f   :  { %v446_v15 = vpop.f32.mrf.mxu0  ;;  %v467_v16 = vsel %vm466_vm2, %v465_v12, -inf  ;;  %937 = vtanh.f32 %v465_v12 }
 0x5a0   :  { %468 = vmax.xlane.f32.xlu1 %v467_v16 }
 0x5a1   :  { %v878_v25 = vpop.f32.mrf.mxu0 }
 0x5a3   :  { %v606_v2 = vpop.f32.mrf.mxu0 }
 0x5a4   :  { %v607_v18 = vadd.f32 %v606_v2, %v564_v54 }
 0x5a5   :  { %v897_v20 = vpop.f32.mrf.mxu0 }
 0x5a6   :  { %v616_v21 = vadd.f32 %v615_v17, %v607_v18 }
 0x5a7   :  { %v609_v4 = vpop.f32.mrf.mxu0 }
 0x5a8   :  { %v617_v6 = vmax.f32 %v616_v21, 0.0 }
 0x5a9   :  { %v898_v22 = vpop.f32.mrf.mxu0 }
 0x5aa   :  { %v618_v23 = vpack.c.bf16 %v617_v6, %v617_v6 }
 0x5ac   :  { %908 = vmatmul.mubr.msk.bf16.vlgmr.msra.gmra.mxu0 %vm66_vm1, %v618_v23  ;;  %vm729_vm1 = vcmask 74776  }
 0x5b1   :  { %734 = vrot.lane.b32.xlu1 %v1054_v37, %s951_s0 }
 0x629   :  { %v469_v19 = vpop.xlane.xlu1 %468 }
 0x62a   :  { %vm470_vm3 = vcmp.ge.f32.partialorder %v465_v12, %v469_v19 }
 0x62b   :  { %v471_v29 = vsel %vm470_vm3, %v1054_v37, 17 }
 0x62c   :  { %v472_v33 = vsel %vm466_vm2, %v471_v29, 2147483647 }
 0x62d   :  { %v474_v36 = vshra.s32 %v472_v33, 16  ;;  %v735_v42 = vpop.permute.xlu1 %734  ;;  %v473_v51 = vand.u32 65535, %v472_v33 }
 0x62f   :  { %v476_v38 = vcvt.s32.f32 %v474_v36  ;;  %v475_v53 = vcvt.s32.f32 %v473_v51 }
 0x66c   :  { %v685_v28 = vpop.f32.mrf.mxu0 }
 0x66d   :  { %v686_v30 = vadd.f32 %v685_v28, %v622_v26 }
 0x66e   :  { %v909_v31 = vpop.f32.mrf.mxu0 }
 0x66f   :  { %v707_v32 = vsel %vm706_vm4, %v686_v30, -1e+09 }
 0x670   :  { %v688_v34 = vpop.f32.mrf.mxu0  ;;  %v709_v35 = vsel %vm708_vm5, %v707_v32, -inf  ;;  %v730_v13 = vsel %vm729_vm1, %v707_v32, -inf  ;;  %939 = vtanh.f32 %v707_v32 }
 0x671   :  { %710 = vmax.xlane.f32.xlu0 %v709_v35 }
 0x672   :  { %v910_v11 = vpop.f32.mrf.mxu0 }
 0x675   :  { %731 = vmax.xlane.f32.xlu0 %v730_v13 }
 0x679   :  { %477 = vmin.xlane.f32.xlu0 %v476_v38 }
 0x6fa   :  { %v711_v39 = vpop.xlane.xlu0 %710 }
 0x6fb   :  { %vm712_vm6 = vcmp.ge.f32.partialorder %v707_v32, %v711_v39 }
 0x6fc   :  { %v713_v40 = vsel %vm712_vm6, %v1054_v37, 3  ;;  %v938_v37 = vpop.eup %937 }
 0x6fd   :  { %v714_v41 = vsel %vm708_vm5, %v713_v40, 2147483647  ;;  %v940_v9 = vpop.eup %939 }
 0x6fe   :  { %v732_v43 = vpop.xlane.xlu0 %731  ;;  %v716_v44 = vshra.s32 %v714_v41, 16  ;;  %v715_v54 = vand.u32 65535, %v714_v41 }
 0x6ff   :  { %vm733_vm7 = vcmp.ge.f32.partialorder %v707_v32, %v732_v43 }
 0x700   :  { %v736_v45 = vsel %vm733_vm7, %v735_v42, 7  ;;  %v718_v46 = vcvt.s32.f32 %v716_v44  ;;  %v717_v56 = vcvt.s32.f32 %v715_v54 }
 0x701   :  { %v737_v47 = vsel %vm729_vm1, %v736_v45, 2147483647 }
 0x702   :  { %719 = vmin.xlane.f32.xlu0 %v718_v46  ;;  %v739_v48 = vshra.s32 %v737_v47, 16  ;;  %v478_v49 = vpop.xlane.xlu0 %477  ;;  %v738_v3 = vand.u32 65535, %v737_v47 }
 0x703   :  { %vm479_vm8 = vcmp.eq.f32.partialorder %v476_v38, %v478_v49  ;;  %v484_v59 = vcvt.f32.s32 %v478_v49 }
 0x704   :  { %v741_v52 = vcvt.s32.f32 %v739_v48  ;;  %v480_v50 = vsel %vm479_vm8, %v475_v53, inf  ;;  %v740_v58 = vcvt.s32.f32 %v738_v3 }
 0x705   :  { %v485_v62 = vshll.u32 %v484_v59, 16 }
 0x706   :  { %742 = vmin.xlane.f32.xlu0 %v741_v52 }
 0x70a   :  { %481 = vmin.xlane.f32.xlu0 %v480_v50 }
 0x720   :  { %489 = vrot.lane.b32.xlu0 %v938_v37, %s952_s25 }
 0x78b   :  { %v720_v55 = vpop.xlane.xlu0 %719 }
 0x78c   :  { %vm721_vm9 = vcmp.eq.f32.partialorder %v718_v46, %v720_v55  ;;  %v726_v1 = vcvt.f32.s32 %v720_v55 }
 0x78d   :  { %v722_v57 = vsel %vm721_vm9, %v717_v56, inf }
 0x78e   :  { %723 = vmin.xlane.f32.xlu1 %v722_v57  ;;  %v727_v15 = vshll.u32 %v726_v1, 16 }
 0x78f   :  { %v743_v5 = vpop.xlane.xlu0 %742 }
 0x790   :  { %vm744_vm10 = vcmp.eq.f32.partialorder %v741_v52, %v743_v5  ;;  %v749_v12 = vcvt.f32.s32 %v743_v5 }
 0x791   :  { %v745_v60 = vsel %vm744_vm10, %v740_v58, inf }
 0x792   :  { %746 = vmin.xlane.f32.xlu0 %v745_v60  ;;  %v750_v25 = vshll.u32 %v749_v12, 16 }
 0x793   :  { %v482_v61 = vpop.xlane.xlu0 %481 }
 0x794   :  { %v483_v63 = vcvt.f32.s32 %v482_v61 }
 0x796   :  { %v486_v7 = vadd.s32 %v485_v62, %v483_v63 }
 0x797   :  { %v490_v0 = vpop.permute.xlu0 %489 }
 0x798   :  { %v494_v8 = vcvt.s32.f32 %v486_v7  ;;  %493 = vst.msk [vmem:[%s1197_s2] sm:$0x3] %vm492_vm11, %v490_v0 }
 0x79a   :  { %496 = vst.msk [vmem:[%s1197_s2] sm:$0x3] %vm495_vm12, %v494_v8 }
 0x7a8   :  { %754 = vrot.lane.b32.xlu0 %v940_v9, %s953_s30 }
 0x817   :  { %v724_v10 = vpop.xlane.xlu1 %723 }
 0x818   :  { %v725_v14 = vcvt.f32.s32 %v724_v10 }
 0x81a   :  { %v728_v17 = vadd.s32 %v727_v15, %v725_v14 }
 0x81b   :  { %v747_v16 = vpop.xlane.xlu0 %746 }
 0x81c   :  { %v748_v2 = vcvt.f32.s32 %v747_v16  ;;  %v761_v21 = vcvt.s32.f32 %v728_v17 }
 0x81e   :  { %v751_v18 = vadd.s32 %v750_v25, %v748_v2 }
 0x81f   :  { %v755_v20 = vpop.permute.xlu0 %754 }
 0x820   :  { %v764_v4 = vcvt.s32.f32 %v751_v18  ;;  %758 = vst.msk [vmem:[%s1197_s2] sm:$0x3] %vm757_vm13, %v755_v20 }
 0x821   :  { %760 = vst.msk [vmem:[%s1197_s2] sm:$0x3] %vm759_vm14, %v755_v20 }
 0x822   :  { %763 = vst.msk [vmem:[%s1197_s2] sm:$0x3] %vm762_vm15, %v761_v21 }
 0x823   :  { %766 = vst.msk [vmem:[%s1197_s2] sm:$0x3] %vm765_vm0, %v764_v4 }

</bundles_post_ra>
